<compile_context>
chip_gen: v7x
topology: tpu7x:2x2x1
jax: 0.10.0
libtpu: 0.0.40
codegen_flags: <defaults>
</compile_context>

<pallas_src>
import functools

import jax
import jax.numpy as jnp
from jax.experimental import pallas as pl
from jax.experimental.pallas import tpu as pltpu


def _gaussian_smearing_kernel(dist_ref, offset_ref, out_ref, *, coeff):
    # dist_ref:   (TE, 1)  block of distances (f32)
    # offset_ref: (1, G)   full offset row, constant index_map -> resident
    # out_ref:    (TE, G)  output block
    d = dist_ref[...]                       # (TE, 1)
    off = offset_ref[...]                   # (1, G)
    diff = d - off                          # broadcast -> (TE, G), f32
    out_ref[...] = jnp.exp(coeff * diff * diff).astype(out_ref.dtype)


def _cdiv(a, b):
    return (a + b - 1) // b


def _round_up(x, m):
    return _cdiv(x, m) * m


def gaussian_smearing(dist, offset, coeff, *, block_e=8192,
                      out_dtype=jnp.float32):
    """dist: any shape (flattened like torch .view(-1, 1)); offset: (G,).

    block_e:   rows per grid step (multiple of 8).  Clamped so the grid keeps
               at least ~4 steps (pipelining + megacore sharding) with a
               floor of 1024 rows.
    out_dtype: jnp.float32 (default, matches torch) or jnp.bfloat16 to halve
               HBM writeback bytes (compute stays f32; cast on store only).
    """
    dist_flat = dist.reshape(-1).astype(jnp.float32)
    e = dist_flat.shape[0]
    g = offset.shape[0]

    # Block clamp: multiple of 8, keep >= ~4 grid steps, floor 1024 rows,
    # never bigger than the (rounded-up) problem itself.
    block_e = _round_up(max(int(block_e), 8), 8)
    block_e = min(block_e, max(_round_up(_cdiv(e, 4), 8), 1024))
    block_e = min(block_e, _round_up(e, 8))

    dist2d = dist_flat.reshape(e, 1)
    offset2d = offset.astype(jnp.float32).reshape(1, g)

    grid = (pl.cdiv(e, block_e),)
    out = pl.pallas_call(
        functools.partial(_gaussian_smearing_kernel, coeff=float(coeff)),
        out_shape=jax.ShapeDtypeStruct((e, g), out_dtype),
        grid=grid,
        in_specs=[
            pl.BlockSpec((block_e, 1), lambda i: (i, 0)),
            pl.BlockSpec((1, g), lambda i: (0, 0)),
        ],
        out_specs=pl.BlockSpec((block_e, g), lambda i: (i, 0)),
        compiler_params=pltpu.CompilerParams(
            dimension_semantics=("parallel",),
            vmem_limit_bytes=32 * 1024 * 1024),
    )(dist2d, offset2d)

    return out


def make_gaussian_smearing_params(start=0.0, stop=5.0, num_gaussians=50):
    # Deterministic parameter setup, mirroring the torch __init__.
    offset = jnp.linspace(start, stop, num_gaussians, dtype=jnp.float32)
    delta = float(offset[1] - offset[0])
    coeff = -0.5 / (delta ** 2)
    return offset, coeff


def _reference(dist, offset, coeff):
    d = dist.reshape(-1, 1).astype(jnp.float32)
    return jnp.exp(coeff * (d - offset.reshape(1, -1)) ** 2)


if __name__ == "__main__":
    start, stop, num_gaussians = 0.0, 5.0, 50
    offset, coeff = make_gaussian_smearing_params(start, stop, num_gaussians)

    key = jax.random.PRNGKey(0)
    k1, k2 = jax.random.split(key)

    # Case 1: small input (100 distances) -> single partial block.
    dist_small = jax.random.uniform(k1, (100,), dtype=jnp.float32,
                                    minval=0.0, maxval=5.0)
    out_small = jax.block_until_ready(
        gaussian_smearing(dist_small, offset, coeff))
    ref_small = _reference(dist_small, offset, coeff)
    assert out_small.shape == (100, num_gaussians)
    assert jnp.allclose(out_small, ref_small, atol=1e-5, rtol=1e-5)

    # Case 2: 4000 distances -> clamp gives 1024-row blocks, 4 grid steps
    # (exercises pipelining and the masked partial last block: 4*1024 > 4000).
    dist_big = jax.random.uniform(k2, (4000,), dtype=jnp.float32,
                                  minval=0.0, maxval=5.0)
    out_big = jax.block_until_ready(
        gaussian_smearing(dist_big, offset, coeff))
    ref_big = _reference(dist_big, offset, coeff)
    assert out_big.shape == (4000, num_gaussians)
    assert jnp.allclose(out_big, ref_big, atol=1e-5, rtol=1e-5)

    # Optional bf16 output path (compute in f32, cast on store).
    out_bf16 = jax.block_until_ready(
        gaussian_smearing(dist_big, offset, coeff, out_dtype=jnp.bfloat16))
    assert out_bf16.dtype == jnp.bfloat16
    assert jnp.allclose(out_bf16.astype(jnp.float32), ref_big,
                        atol=1e-2, rtol=1e-2)

    print("KERNEL_OK")
</pallas_src>

<mosaic_0001>
module attributes {stable_mosaic.version = 11 : i64} {
  func.func @_gaussian_smearing_kernel(%arg0: i32, %arg1: memref<104x1xf32, #tpu.memory_space<vmem>>, %arg2: memref<1x50xf32, #tpu.memory_space<vmem>>, %arg3: memref<104x50xf32, #tpu.memory_space<vmem>>) attributes {dimension_semantics = [#tpu.dimension_semantics<parallel>], iteration_bounds = array<i64: 1>, scalar_prefetch = 0 : i64, scratch_operands = 0 : i64, tpu.core_type = #tpu.core_type<tc>, window_params = [{transform_indices = @transform_0, window_bounds = array<i64: 104, 1>}, {pipeline_mode = #tpu.pipeline_mode<synchronous>, transform_indices = @transform_1, window_bounds = array<i64: 1, 50>}, {transform_indices = @transform_2, window_bounds = array<i64: 104, 50>}]} {
    %c0 = arith.constant 0 : index
    %c0_0 = arith.constant 0 : index
    %0 = vector.load %arg1[%c0, %c0_0] : memref<104x1xf32, #tpu.memory_space<vmem>>, vector<104x1xf32>
    %c0_1 = arith.constant 0 : index
    %c0_2 = arith.constant 0 : index
    %1 = vector.load %arg2[%c0_1, %c0_2] : memref<1x50xf32, #tpu.memory_space<vmem>>, vector<1x50xf32>
    %2 = vector.broadcast %0 : vector<104x1xf32> to vector<104x50xf32>
    %3 = vector.broadcast %1 : vector<1x50xf32> to vector<104x50xf32>
    %4 = arith.subf %2, %3 : vector<104x50xf32>
    %cst = arith.constant -48.0200043 : f32
    %5 = vector.broadcast %cst : f32 to vector<104x50xf32>
    %6 = arith.mulf %5, %4 : vector<104x50xf32>
    %7 = arith.mulf %6, %4 : vector<104x50xf32>
    %8 = math.exp %7 : vector<104x50xf32>
    %c0_3 = arith.constant 0 : index
    %c0_4 = arith.constant 0 : index
    %9 = vector.load %arg3[%c0_3, %c0_4] : memref<104x50xf32, #tpu.memory_space<vmem>>, vector<104x50xf32>
    tpu.vector_store %arg3[%c0_3, %c0_4], %8 {strides = array<i32>} : memref<104x50xf32, #tpu.memory_space<vmem>>, vector<104x50xf32>,
    return
  }
  func.func @transform_0(%arg0: i32) -> (i32, i32) {
    %c0_i32 = arith.constant 0 : i32
    %c0_i32_0 = arith.constant 0 : i32
    return %arg0, %c0_i32 : i32, i32
  }
  func.func @transform_1(%arg0: i32) -> (i32, i32) {
    %c0_i32 = arith.constant 0 : i32
    %c0_i32_0 = arith.constant 0 : i32
    %c0_i32_1 = arith.constant 0 : i32
    return %c0_i32, %c0_i32_0 : i32, i32
  }
  func.func @transform_2(%arg0: i32) -> (i32, i32) {
    %c0_i32 = arith.constant 0 : i32
    %c0_i32_0 = arith.constant 0 : i32
    return %arg0, %c0_i32 : i32, i32
  }
}

</mosaic_0001>

<bundles_post_ra>
// kernel: tpu_custom_call.1
= control target key start
LH: loop header
LB: loop body
LE: loop exit
PB: predicated region body
PF: predicated region fallthrough
CT: control target
= control target key end

     0   :  { %v209_v0 = vmov 0   ;;  %vm161_vm0 = vcmask 408576   ;;  %s334_s0 = inlined_call_operand.vmem [shape: f32[100,1], index: 0, kind: input, shape index: {}]   ;;  %s335_s1 = inlined_call_operand.vmem [shape: f32[1,50], index: 1, kind: input, shape index: {}]   ;;  %s336_s2 = inlined_call_operand.vmem [shape: f32[100,50], index: 2, kind: output, shape index: {}]  }
   0x1   :  { %182 = vset.pattern.permute.xlu1 %v209_v0  ;;  %181 = vset.pattern.permute.xlu0 %v209_v0  ;;  %v13_v1 = vld [vmem:[%s334_s0 + $0x10] sm:$0xff]  ;;  %v11_v2 = vld [vmem:[%s334_s0] sm:$0xff]  ;;  %v14_v3 = vld [vmem:[%s334_s0 + $0x18] sm:$0xff] }
   0x2   :  { %37 = vperm.xlu1 %182, %v13_v1   ;;  %27 = vperm.xlu0 %181, %v11_v2   ;;  %v12_v4 = vld [vmem:[%s334_s0 + $0x8] sm:$0xff]  ;;  %v15_v6 = vld [vmem:[%s334_s0 + $0x20] sm:$0xff]  ;;  %v18_v7 = vld [vmem:[%s334_s0 + $0x38] sm:$0xff] }
   0x3   :  { %v16_v5 = vld [vmem:[%s334_s0 + $0x28] sm:$0xff]  ;;  %v17_v8 = vld [vmem:[%s334_s0 + $0x30] sm:$0xff]  ;;  %v19_v10 = vld [vmem:[%s334_s0 + $0x40] sm:$0xff] }
   0x4   :  { %v20_v9 = vld [vmem:[%s334_s0 + $0x48] sm:$0xff]  ;;  %v22_v11 = vld [vmem:[%s334_s0 + $0x58] sm:$0xff]  ;;  %v21_v12 = vld [vmem:[%s334_s0 + $0x50] sm:$0xff] }
   0x5   :  { %v23_v13 = vld [vmem:[%s334_s0 + $0x60] sm:$0xff] }
   0x6   :  { %42 = vperm.xlu1 %182, %v14_v3   ;;  %32 = vperm.xlu0 %181, %v12_v4   ;;  %v267_v14 = vld [vmem:[%s335_s1] ss:$0 sm:$0xff] }
   0xa   :  { %52 = vperm.xlu1 %182, %v16_v5   ;;  %47 = vperm.xlu0 %181, %v15_v6  }
   0xe   :  { %62 = vperm.xlu1 %182, %v18_v7   ;;  %57 = vperm.xlu0 %181, %v17_v8  }
  0x12   :  { %72 = vperm.xlu1 %182, %v20_v9   ;;  %67 = vperm.xlu0 %181, %v19_v10  }
  0x16   :  { %82 = vperm.xlu1 %182, %v22_v11   ;;  %77 = vperm.xlu0 %181, %v21_v12  }
  0x1a   :  { %87 = vperm.xlu0 %181, %v23_v13  }
  0x81   :  { %v38_v15 = vpop.permute.xlu1 %37  ;;  %v28_v16 = vpop.permute.xlu0 %27 }
  0x82   :  { %v98_v17 = vsub.f32 %v38_v15, %v267_v14  ;;  %v96_v18 = vsub.f32 %v28_v16, %v267_v14 }
  0x84   :  { %v111_v19 = vmul.f32 -48.020004, %v98_v17  ;;  %v109_v20 = vmul.f32 -48.020004, %v96_v18 }
  0x85   :  { %v43_v21 = vpop.permute.xlu1 %42  ;;  %v33_v22 = vpop.permute.xlu0 %32 }
  0x86   :  { %v124_v23 = vmul.f32 %v111_v19, %v98_v17  ;;  %v122_v24 = vmul.f32 %v109_v20, %v96_v18  ;;  %v99_v25 = vsub.f32 %v43_v21, %v267_v14  ;;  %v97_v26 = vsub.f32 %v33_v22, %v267_v14 }
  0x88   :  { %v139_v27 = vmul.f32 1.442695, %v124_v23  ;;  %v135_v28 = vmul.f32 1.442695, %v122_v24  ;;  %v112_v29 = vmul.f32 -48.020004, %v99_v25 }
  0x89   :  { %v110_v30 = vmul.f32 -48.020004, %v97_v26  ;;  %v53_v31 = vpop.permute.xlu1 %52  ;;  %v48_v32 = vpop.permute.xlu0 %47 }
  0x8a   :  { %183 = vpow2.f32 %v139_v27  ;;  %v125_v33 = vmul.f32 %v112_v29, %v99_v25  ;;  %v101_v34 = vsub.f32 %v53_v31, %v267_v14  ;;  %v100_v35 = vsub.f32 %v48_v32, %v267_v14 }
  0x8b   :  { %185 = vpow2.f32 %v135_v28  ;;  %v123_v36 = vmul.f32 %v110_v30, %v97_v26 }
  0x8c   :  { %v141_v37 = vmul.f32 1.442695, %v125_v33  ;;  %v114_v38 = vmul.f32 -48.020004, %v101_v34  ;;  %v113_v39 = vmul.f32 -48.020004, %v100_v35 }
  0x8d   :  { %v137_v40 = vmul.f32 1.442695, %v123_v36  ;;  %v63_v41 = vpop.permute.xlu1 %62  ;;  %v58_v42 = vpop.permute.xlu0 %57 }
  0x8e   :  { %187 = vpow2.f32 %v141_v37  ;;  %v127_v43 = vmul.f32 %v114_v38, %v101_v34  ;;  %v126_v44 = vmul.f32 %v113_v39, %v100_v35  ;;  %v103_v45 = vsub.f32 %v63_v41, %v267_v14 }
  0x8f   :  { %189 = vpow2.f32 %v137_v40  ;;  %v102_v46 = vsub.f32 %v58_v42, %v267_v14 }
  0x90   :  { %v145_v47 = vmul.f32 1.442695, %v127_v43  ;;  %v143_v48 = vmul.f32 1.442695, %v126_v44  ;;  %v116_v49 = vmul.f32 -48.020004, %v103_v45 }
  0x91   :  { %v115_v50 = vmul.f32 -48.020004, %v102_v46  ;;  %v73_v51 = vpop.permute.xlu1 %72  ;;  %v68_v52 = vpop.permute.xlu0 %67 }
  0x92   :  { %191 = vpow2.f32 %v145_v47  ;;  %v129_v53 = vmul.f32 %v116_v49, %v103_v45  ;;  %v105_v54 = vsub.f32 %v73_v51, %v267_v14  ;;  %v104_v55 = vsub.f32 %v68_v52, %v267_v14 }
  0x93   :  { %193 = vpow2.f32 %v143_v48  ;;  %v128_v56 = vmul.f32 %v115_v50, %v102_v46 }
  0x94   :  { %v184_v57 = vpop.eup %183  ;;  %v149_v58 = vmul.f32 1.442695, %v129_v53  ;;  %v118_v59 = vmul.f32 -48.020004, %v105_v54  ;;  %v117_v60 = vmul.f32 -48.020004, %v104_v55 }
  0x95   :  { %v186_v61 = vpop.eup %185  ;;  %164 = vst.msk [vmem:[%s336_s2 + $0x10] sm:$0xff] %vm161_vm0, %v184_v57  ;;  %v147_v62 = vmul.f32 1.442695, %v128_v56  ;;  %v83_v63 = vpop.permute.xlu1 %82 }
  0x96   :  { %v78_v0 = vpop.permute.xlu0 %77  ;;  %162 = vst.msk [vmem:[%s336_s2] sm:$0xff] %vm161_vm0, %v186_v61  ;;  %195 = vpow2.f32 %v149_v58  ;;  %v131_v1 = vmul.f32 %v118_v59, %v105_v54  ;;  %v130_v2 = vmul.f32 %v117_v60, %v104_v55  ;;  %v107_v3 = vsub.f32 %v83_v63, %v267_v14 }
  0x97   :  { %197 = vpow2.f32 %v147_v62  ;;  %v106_v4 = vsub.f32 %v78_v0, %v267_v14 }
  0x98   :  { %v188_v5 = vpop.eup %187  ;;  %v153_v6 = vmul.f32 1.442695, %v131_v1  ;;  %v151_v7 = vmul.f32 1.442695, %v130_v2  ;;  %v120_v8 = vmul.f32 -48.020004, %v107_v3 }
  0x99   :  { %v190_v9 = vpop.eup %189  ;;  %165 = vst.msk [vmem:[%s336_s2 + $0x18] sm:$0xff] %vm161_vm0, %v188_v5  ;;  %v119_v10 = vmul.f32 -48.020004, %v106_v4 }
  0x9a   :  { %v88_v11 = vpop.permute.xlu0 %87  ;;  %163 = vst.msk [vmem:[%s336_s2 + $0x8] sm:$0xff] %vm161_vm0, %v190_v9  ;;  %199 = vpow2.f32 %v153_v6  ;;  %v133_v12 = vmul.f32 %v120_v8, %v107_v3 }
  0x9b   :  { %v108_v13 = vsub.f32 %v88_v11, %v267_v14  ;;  %201 = vpow2.f32 %v151_v7  ;;  %v132_v15 = vmul.f32 %v119_v10, %v106_v4 }
  0x9c   :  { %v192_v16 = vpop.eup %191  ;;  %v157_v17 = vmul.f32 1.442695, %v133_v12 }
  0x9d   :  { %v121_v18 = vmul.f32 -48.020004, %v108_v13  ;;  %v194_v19 = vpop.eup %193  ;;  %167 = vst.msk [vmem:[%s336_s2 + $0x28] sm:$0xff] %vm161_vm0, %v192_v16  ;;  %v155_v20 = vmul.f32 1.442695, %v132_v15 }
  0x9e   :  { %166 = vst.msk [vmem:[%s336_s2 + $0x20] sm:$0xff] %vm161_vm0, %v194_v19  ;;  %203 = vpow2.f32 %v157_v17 }
  0x9f   :  { %v134_v21 = vmul.f32 %v121_v18, %v108_v13  ;;  %205 = vpow2.f32 %v155_v20 }
  0xa0   :  { %v196_v14 = vpop.eup %195 }
  0xa1   :  { %v159_v22 = vmul.f32 1.442695, %v134_v21  ;;  %v198_v23 = vpop.eup %197  ;;  %169 = vst.msk [vmem:[%s336_s2 + $0x38] sm:$0xff] %vm161_vm0, %v196_v14 }
  0xa2   :  { %168 = vst.msk [vmem:[%s336_s2 + $0x30] sm:$0xff] %vm161_vm0, %v198_v23 }
  0xa3   :  { %207 = vpow2.f32 %v159_v22 }
  0xa4   :  { %v200_v24 = vpop.eup %199 }
  0xa5   :  { %v202_v25 = vpop.eup %201  ;;  %171 = vst.msk [vmem:[%s336_s2 + $0x48] sm:$0xff] %vm161_vm0, %v200_v24 }
  0xa6   :  { %170 = vst.msk [vmem:[%s336_s2 + $0x40] sm:$0xff] %vm161_vm0, %v202_v25 }
  0xa8   :  { %v204_v26 = vpop.eup %203 }
  0xa9   :  { %v206_v27 = vpop.eup %205  ;;  %173 = vst.msk [vmem:[%s336_s2 + $0x58] sm:$0xff] %vm161_vm0, %v204_v26 }
  0xaa   :  { %172 = vst.msk [vmem:[%s336_s2 + $0x50] sm:$0xff] %vm161_vm0, %v206_v27 }
  0xad   :  { %v208_v28 = vpop.eup %207 }
  0xae   :  { %174 = vst.msk [vmem:[%s336_s2 + $0x60] sm:$0xff] %vm161_vm0, %v208_v28 }

</bundles_post_ra>
